<compile_context>
chip_gen: v6e
topology: v6e:2x2x1
jax: 0.10.0
libtpu: 0.0.40
codegen_flags: <defaults>
</compile_context>

<pallas_src>
import functools
import math

import jax
import jax.numpy as jnp
from jax.experimental import pallas as pl
from jax.experimental.pallas import tpu as pltpu

KH = KW = 7        # MaxPool kernel
PAD_H = PAD_W = 3  # stride=1, kernel=7 -> total pad 6, split 3/3 (PyTorch SAME)


def _cam_kernel(H, W, x_ref, w1_ref, b1_ref, w2_ref, b2_ref, o_ref):
    """One grid step = NB packed batch images, flattened spatial on lanes.

    x_ref : (1, CT, S)  VMEM   CT = NB*C sublanes (multiple of 8), S = H*W lanes
    w1_ref: (NB*C1, CT) VMEM   block-diag conv1x1_1 weight  kron(I_NB, W1)
    b1_ref: (NB*C1, 1)  VMEM
    w2_ref: (CT, NB*C1) VMEM   block-diag conv1x1_2 weight  kron(I_NB, W2)
    b2_ref: (CT, 1)     VMEM
    o_ref : (1, CT, S)  VMEM
    """
    f32 = jnp.float32
    CT = x_ref.shape[1]
    S = x_ref.shape[2]

    x = x_ref[0].astype(f32)                                   # (CT, S)

    # Lane / column indices.  col = lane mod W must be EXACT: a rounding error
    # would let a shift's validity mask admit a neighbouring row's pixel.
    lane = jax.lax.broadcasted_iota(jnp.int32, (CT, S), 1)
    if W & (W - 1) == 0:                       # power-of-two width: bitmask
        col = lane & (W - 1)
    else:
        # Approximate quotient via f32 (lane < 2**24 is exact), then a +-1
        # integer correction makes col exact for any W (review concern fixed).
        q = jnp.floor(lane.astype(f32) * (1.0 / W)).astype(jnp.int32)
        col = lane - q * W
        col = jnp.where(col < 0, col + W, col)
        col = jnp.where(col >= W, col - W, col)

    # --------------- separable 7x7 max pool (SAME, pad = -inf) ---------------
    # Horizontal pass: running max over column offsets d = -3..3 (d=0 is x).
    # pltpu.roll follows jnp.roll semantics, so shift = -d gives
    # shifted[i] == x[i + d]; one compare per shift masks row crossings.
    rowmax = x
    for d in range(-PAD_W, PAD_W + 1):
        if d == 0:
            continue
        shifted = pltpu.roll(x, (-d) % S, 1)                   # x[:, i + d]
        valid = (col >= -d) if d < 0 else (col < W - d)
        rowmax = jnp.maximum(rowmax, jnp.where(valid, shifted, -jnp.inf))

    # Vertical pass: offsets are whole rows (d*W); validity is a flat bound.
    pooled = rowmax
    for d in range(-PAD_H, PAD_H + 1):
        if d == 0:
            continue
        shifted = pltpu.roll(rowmax, (-d * W) % S, 1)          # rowmax[:, i + d*W]
        valid = (lane >= -d * W) if d < 0 else (lane < S - d * W)
        pooled = jnp.maximum(pooled, jnp.where(valid, shifted, -jnp.inf))

    # ------- 1x1 convs: block-diagonal matmuls over the NB packed images -----
    h1 = jnp.dot(w1_ref[...], pooled, preferred_element_type=f32) + b1_ref[...]
    h1 = jnp.maximum(h1, 0.0)                                  # ReLU (NB*C1, S)
    logits = jnp.dot(w2_ref[...], h1, preferred_element_type=f32) + b2_ref[...]

    # Sigmoid = 1 / (1 + exp(-z)): exp + approx reciprocal live on the EUP
    # slot; one Newton step restores f32 accuracy at ~3 VPU ops.
    e = jnp.exp(-logits)
    den = 1.0 + e
    r = pl.reciprocal(den, approx=True)
    att = r * (2.0 - den * r)                                  # (CT, S)

    # ------------------------ channel-attention gating -----------------------
    o_ref[0] = (x * att).astype(o_ref.dtype)


def _pick_batch_pack(N, C):
    """Pick NB (images packed per grid step) so NB*C is a multiple of 8,
    N % NB == 0, and the grid keeps >= 2 steps when possible (megacore /
    v7x dual TensorCore)."""
    nb0 = 8 // math.gcd(C, 8)
    cands = [nb for nb in range(nb0, N + 1, nb0) if N % nb == 0]
    if not cands:
        return 1                       # fall back to un-packed (still correct)
    for nb in reversed(cands):         # largest packing that keeps grid >= 2
        if N // nb >= 2:
            return nb
    return cands[0]


def cam_forward(x_nchw, w1, b1, w2, b2, *, io_dtype=jnp.float32):
    """x_nchw: (N, C, H, W) (PyTorch layout).
    w1: (C1, C, 1, 1), b1: (C1,), w2: (C2, C1, 1, 1), b2: (C2,), C2 == C.
    io_dtype: set to jnp.bfloat16 to halve HBM traffic on bandwidth-bound
    parts (v5e/v6e); compute stays f32 in-kernel, numerics differ slightly."""
    N, C, H, W = x_nchw.shape
    C1 = w1.shape[0]
    C2 = w2.shape[0]
    assert C2 == C, "conv1x1_2_size must equal in_channels for x * att to broadcast"
    S = H * W
    f32 = jnp.float32

    NB = _pick_batch_pack(N, C)        # images per grid step
    NG = N // NB                       # grid length
    CT = NB * C                        # packed sublane count

    # Free row-major reshapes only (no transpose passes over HBM).
    x_flat = x_nchw.astype(io_dtype).reshape(NG, CT, S)

    # Block-diagonal weights: one matmul handles all NB images per step.
    w1m = w1[:, :, 0, 0].astype(f32)                 # (C1, C)
    w2m = w2[:, :, 0, 0].astype(f32)                 # (C2, C1)
    eye = jnp.eye(NB, dtype=f32)
    w1bd = jnp.kron(eye, w1m)                        # (NB*C1, NB*C)
    w2bd = jnp.kron(eye, w2m)                        # (NB*C,  NB*C1)
    b1bd = jnp.tile(b1.astype(f32).reshape(C1, 1), (NB, 1))   # (NB*C1, 1)
    b2bd = jnp.tile(b2.astype(f32).reshape(C2, 1), (NB, 1))   # (NB*C,  1)

    kernel = functools.partial(_cam_kernel, H, W)

    out_flat = pl.pallas_call(
        kernel,
        out_shape=jax.ShapeDtypeStruct((NG, CT, S), io_dtype),
        grid_spec=pltpu.PrefetchScalarGridSpec(
            num_scalar_prefetch=0,
            grid=(NG,),
            in_specs=[
                pl.BlockSpec((1, CT, S), lambda b: (b, 0, 0)),
                pl.BlockSpec((NB * C1, CT), lambda b: (0, 0)),
                pl.BlockSpec((NB * C1, 1), lambda b: (0, 0)),
                pl.BlockSpec((CT, NB * C1), lambda b: (0, 0)),
                pl.BlockSpec((CT, 1), lambda b: (0, 0)),
            ],
            out_specs=pl.BlockSpec((1, CT, S), lambda b: (b, 0, 0)),
        ),
        compiler_params=pltpu.CompilerParams(
            # Packed-batch steps are independent: shard across cores.
            dimension_semantics=("parallel",),
        ),
    )(x_flat, w1bd, b1bd, w2bd, b2bd)

    return out_flat.reshape(N, C, H, W).astype(io_dtype)


def cam_reference(x_nchw, w1, b1, w2, b2):
    """Pure-JAX reference (NCHW), mirrors the PyTorch forward."""
    xp = jnp.pad(x_nchw, ((0, 0), (0, 0), (PAD_H, PAD_H), (PAD_W, PAD_W)),
                 constant_values=-jnp.inf)
    pooled = jax.lax.reduce_window(xp, -jnp.inf, jax.lax.max,
                                   (1, 1, KH, KW), (1, 1, 1, 1), "VALID")
    h1 = jax.nn.relu(jnp.einsum("nchw,oc->nohw", pooled, w1[:, :, 0, 0])
                     + b1[None, :, None, None])
    att = jax.nn.sigmoid(jnp.einsum("nchw,oc->nohw", h1, w2[:, :, 0, 0])
                         + b2[None, :, None, None])
    return x_nchw * att


if __name__ == "__main__":
    # CAMModule(in_channels=4, conv1x1_1_size=8, conv1x1_2_size=4)
    # N=4 so NB=2 packing still leaves a 2-step "parallel" grid.
    N, C, H, W = 4, 4, 16, 16
    C1, C2 = 8, 4

    key = jax.random.PRNGKey(0)
    kx, kw1, kb1, kw2, kb2 = jax.random.split(key, 5)
    x = jax.random.normal(kx, (N, C, H, W), dtype=jnp.float32)
    w1 = jax.random.normal(kw1, (C1, C, 1, 1), dtype=jnp.float32) * 0.5
    b1 = jax.random.normal(kb1, (C1,), dtype=jnp.float32) * 0.1
    w2 = jax.random.normal(kw2, (C2, C1, 1, 1), dtype=jnp.float32) * 0.5
    b2 = jax.random.normal(kb2, (C2,), dtype=jnp.float32) * 0.1

    out = cam_forward(x, w1, b1, w2, b2)
    out = jax.block_until_ready(out)

    ref = cam_reference(x, w1, b1, w2, b2)
    assert out.shape == (N, C, H, W)
    # Tolerance covers MXU f32 rounding and the Newton-refined EUP reciprocal
    # in the sigmoid; structural errors (wrong shift/mask/pool) are O(0.1-1).
    assert jnp.allclose(out, ref, rtol=5e-4, atol=5e-4), "mismatch vs reference"

    print("KERNEL_OK")
</pallas_src>

<mosaic_0001>
module attributes {stable_mosaic.version = 11 : i64} {
  func.func @_cam_kernel(%arg0: i32, %arg1: memref<1x8x256xf32, #tpu.memory_space<vmem>>, %arg2: memref<16x8xf32, #tpu.memory_space<vmem>>, %arg3: memref<16x1xf32, #tpu.memory_space<vmem>>, %arg4: memref<8x16xf32, #tpu.memory_space<vmem>>, %arg5: memref<8x1xf32, #tpu.memory_space<vmem>>, %arg6: memref<1x8x256xf32, #tpu.memory_space<vmem>>) attributes {dimension_semantics = [#tpu.dimension_semantics<parallel>], iteration_bounds = array<i64: 2>, scalar_prefetch = 0 : i64, scratch_operands = 0 : i64, tpu.core_type = #tpu.core_type<tc>, window_params = [{transform_indices = @transform_0, window_bounds = array<i64: 1, 8, 256>}, {pipeline_mode = #tpu.pipeline_mode<synchronous>, transform_indices = @transform_1, window_bounds = array<i64: 16, 8>}, {pipeline_mode = #tpu.pipeline_mode<synchronous>, transform_indices = @transform_2, window_bounds = array<i64: 16, 1>}, {pipeline_mode = #tpu.pipeline_mode<synchronous>, transform_indices = @transform_3, window_bounds = array<i64: 8, 16>}, {pipeline_mode = #tpu.pipeline_mode<synchronous>, transform_indices = @transform_4, window_bounds = array<i64: 8, 1>}, {transform_indices = @transform_5, window_bounds = array<i64: 1, 8, 256>}]} {
    %c0 = arith.constant 0 : index
    %c0_0 = arith.constant 0 : index
    %c0_1 = arith.constant 0 : index
    %0 = vector.load %arg1[%c0, %c0_0, %c0_1] : memref<1x8x256xf32, #tpu.memory_space<vmem>>, vector<1x8x256xf32>
    %1 = vector.shape_cast %0 : vector<1x8x256xf32> to vector<8x256xf32>
    %2 = tpu.iota {dimensions = array<i32: 1>} : vector<8x256xi32>
    %c15_i32 = arith.constant 15 : i32
    %3 = vector.broadcast %c15_i32 : i32 to vector<8x256xi32>
    %4 = arith.andi %2, %3 : vector<8x256xi32>
    %c3_i32 = arith.constant 3 : i32
    %5 = tpu.dynamic_rotate %1 by %c3_i32 dim 1 : vector<8x256xf32>, i32 -> vector<8x256xf32>
    %c3_i32_2 = arith.constant 3 : i32
    %6 = vector.broadcast %c3_i32_2 : i32 to vector<8x256xi32>
    %7 = arith.cmpi sge, %4, %6 : vector<8x256xi32>
    %cst = arith.constant 0xFF800000 : f32
    %8 = vector.broadcast %cst : f32 to vector<8x256xf32>
    %9 = arith.select %7, %5, %8 : vector<8x256xi1>, vector<8x256xf32>
    %10 = arith.maximumf %1, %9 : vector<8x256xf32>
    %c2_i32 = arith.constant 2 : i32
    %11 = tpu.dynamic_rotate %1 by %c2_i32 dim 1 : vector<8x256xf32>, i32 -> vector<8x256xf32>
    %c2_i32_3 = arith.constant 2 : i32
    %12 = vector.broadcast %c2_i32_3 : i32 to vector<8x256xi32>
    %13 = arith.cmpi sge, %4, %12 : vector<8x256xi32>
    %cst_4 = arith.constant 0xFF800000 : f32
    %14 = vector.broadcast %cst_4 : f32 to vector<8x256xf32>
    %15 = arith.select %13, %11, %14 : vector<8x256xi1>, vector<8x256xf32>
    %16 = arith.maximumf %10, %15 : vector<8x256xf32>
    %c1_i32 = arith.constant 1 : i32
    %17 = tpu.dynamic_rotate %1 by %c1_i32 dim 1 : vector<8x256xf32>, i32 -> vector<8x256xf32>
    %c1_i32_5 = arith.constant 1 : i32
    %18 = vector.broadcast %c1_i32_5 : i32 to vector<8x256xi32>
    %19 = arith.cmpi sge, %4, %18 : vector<8x256xi32>
    %cst_6 = arith.constant 0xFF800000 : f32
    %20 = vector.broadcast %cst_6 : f32 to vector<8x256xf32>
    %21 = arith.select %19, %17, %20 : vector<8x256xi1>, vector<8x256xf32>
    %22 = arith.maximumf %16, %21 : vector<8x256xf32>
    %c255_i32 = arith.constant 255 : i32
    %23 = tpu.dynamic_rotate %1 by %c255_i32 dim 1 : vector<8x256xf32>, i32 -> vector<8x256xf32>
    %c15_i32_7 = arith.constant 15 : i32
    %24 = vector.broadcast %c15_i32_7 : i32 to vector<8x256xi32>
    %25 = arith.cmpi slt, %4, %24 : vector<8x256xi32>
    %cst_8 = arith.constant 0xFF800000 : f32
    %26 = vector.broadcast %cst_8 : f32 to vector<8x256xf32>
    %27 = arith.select %25, %23, %26 : vector<8x256xi1>, vector<8x256xf32>
    %28 = arith.maximumf %22, %27 : vector<8x256xf32>
    %c254_i32 = arith.constant 254 : i32
    %29 = tpu.dynamic_rotate %1 by %c254_i32 dim 1 : vector<8x256xf32>, i32 -> vector<8x256xf32>
    %c14_i32 = arith.constant 14 : i32
    %30 = vector.broadcast %c14_i32 : i32 to vector<8x256xi32>
    %31 = arith.cmpi slt, %4, %30 : vector<8x256xi32>
    %cst_9 = arith.constant 0xFF800000 : f32
    %32 = vector.broadcast %cst_9 : f32 to vector<8x256xf32>
    %33 = arith.select %31, %29, %32 : vector<8x256xi1>, vector<8x256xf32>
    %34 = arith.maximumf %28, %33 : vector<8x256xf32>
    %c253_i32 = arith.constant 253 : i32
    %35 = tpu.dynamic_rotate %1 by %c253_i32 dim 1 : vector<8x256xf32>, i32 -> vector<8x256xf32>
    %c13_i32 = arith.constant 13 : i32
    %36 = vector.broadcast %c13_i32 : i32 to vector<8x256xi32>
    %37 = arith.cmpi slt, %4, %36 : vector<8x256xi32>
    %cst_10 = arith.constant 0xFF800000 : f32
    %38 = vector.broadcast %cst_10 : f32 to vector<8x256xf32>
    %39 = arith.select %37, %35, %38 : vector<8x256xi1>, vector<8x256xf32>
    %40 = arith.maximumf %34, %39 : vector<8x256xf32>
    %c48_i32 = arith.constant 48 : i32
    %41 = tpu.dynamic_rotate %40 by %c48_i32 dim 1 : vector<8x256xf32>, i32 -> vector<8x256xf32>
    %c48_i32_11 = arith.constant 48 : i32
    %42 = vector.broadcast %c48_i32_11 : i32 to vector<8x256xi32>
    %43 = arith.cmpi sge, %2, %42 : vector<8x256xi32>
    %cst_12 = arith.constant 0xFF800000 : f32
    %44 = vector.broadcast %cst_12 : f32 to vector<8x256xf32>
    %45 = arith.select %43, %41, %44 : vector<8x256xi1>, vector<8x256xf32>
    %46 = arith.maximumf %40, %45 : vector<8x256xf32>
    %c32_i32 = arith.constant 32 : i32
    %47 = tpu.dynamic_rotate %40 by %c32_i32 dim 1 : vector<8x256xf32>, i32 -> vector<8x256xf32>
    %c32_i32_13 = arith.constant 32 : i32
    %48 = vector.broadcast %c32_i32_13 : i32 to vector<8x256xi32>
    %49 = arith.cmpi sge, %2, %48 : vector<8x256xi32>
    %cst_14 = arith.constant 0xFF800000 : f32
    %50 = vector.broadcast %cst_14 : f32 to vector<8x256xf32>
    %51 = arith.select %49, %47, %50 : vector<8x256xi1>, vector<8x256xf32>
    %52 = arith.maximumf %46, %51 : vector<8x256xf32>
    %c16_i32 = arith.constant 16 : i32
    %53 = tpu.dynamic_rotate %40 by %c16_i32 dim 1 : vector<8x256xf32>, i32 -> vector<8x256xf32>
    %c16_i32_15 = arith.constant 16 : i32
    %54 = vector.broadcast %c16_i32_15 : i32 to vector<8x256xi32>
    %55 = arith.cmpi sge, %2, %54 : vector<8x256xi32>
    %cst_16 = arith.constant 0xFF800000 : f32
    %56 = vector.broadcast %cst_16 : f32 to vector<8x256xf32>
    %57 = arith.select %55, %53, %56 : vector<8x256xi1>, vector<8x256xf32>
    %58 = arith.maximumf %52, %57 : vector<8x256xf32>
    %c240_i32 = arith.constant 240 : i32
    %59 = tpu.dynamic_rotate %40 by %c240_i32 dim 1 : vector<8x256xf32>, i32 -> vector<8x256xf32>
    %c240_i32_17 = arith.constant 240 : i32
    %60 = vector.broadcast %c240_i32_17 : i32 to vector<8x256xi32>
    %61 = arith.cmpi slt, %2, %60 : vector<8x256xi32>
    %cst_18 = arith.constant 0xFF800000 : f32
    %62 = vector.broadcast %cst_18 : f32 to vector<8x256xf32>
    %63 = arith.select %61, %59, %62 : vector<8x256xi1>, vector<8x256xf32>
    %64 = arith.maximumf %58, %63 : vector<8x256xf32>
    %c224_i32 = arith.constant 224 : i32
    %65 = tpu.dynamic_rotate %40 by %c224_i32 dim 1 : vector<8x256xf32>, i32 -> vector<8x256xf32>
    %c224_i32_19 = arith.constant 224 : i32
    %66 = vector.broadcast %c224_i32_19 : i32 to vector<8x256xi32>
    %67 = arith.cmpi slt, %2, %66 : vector<8x256xi32>
    %cst_20 = arith.constant 0xFF800000 : f32
    %68 = vector.broadcast %cst_20 : f32 to vector<8x256xf32>
    %69 = arith.select %67, %65, %68 : vector<8x256xi1>, vector<8x256xf32>
    %70 = arith.maximumf %64, %69 : vector<8x256xf32>
    %c208_i32 = arith.constant 208 : i32
    %71 = tpu.dynamic_rotate %40 by %c208_i32 dim 1 : vector<8x256xf32>, i32 -> vector<8x256xf32>
    %c208_i32_21 = arith.constant 208 : i32
    %72 = vector.broadcast %c208_i32_21 : i32 to vector<8x256xi32>
    %73 = arith.cmpi slt, %2, %72 : vector<8x256xi32>
    %cst_22 = arith.constant 0xFF800000 : f32
    %74 = vector.broadcast %cst_22 : f32 to vector<8x256xf32>
    %75 = arith.select %73, %71, %74 : vector<8x256xi1>, vector<8x256xf32>
    %76 = arith.maximumf %70, %75 : vector<8x256xf32>
    %c0_23 = arith.constant 0 : index
    %c0_24 = arith.constant 0 : index
    %77 = vector.load %arg2[%c0_23, %c0_24] : memref<16x8xf32, #tpu.memory_space<vmem>>, vector<16x8xf32>
    %cst_25 = arith.constant dense<0.000000e+00> : vector<16x256xf32>
    %78 = tpu.matmul %77, %76, %cst_25 {dimension_numbers = #tpu.dot_dimension_numbers<[1], [0], [0], [1], [0, 0, 1, 1], [], []>} : vector<16x8xf32>, vector<8x256xf32>, vector<16x256xf32> -> vector<16x256xf32>
    %c0_26 = arith.constant 0 : index
    %c0_27 = arith.constant 0 : index
    %79 = vector.load %arg3[%c0_26, %c0_27] : memref<16x1xf32, #tpu.memory_space<vmem>>, vector<16x1xf32>
    %80 = vector.broadcast %79 : vector<16x1xf32> to vector<16x256xf32>
    %81 = arith.addf %78, %80 : vector<16x256xf32>
    %cst_28 = arith.constant 0.000000e+00 : f32
    %82 = vector.broadcast %cst_28 : f32 to vector<16x256xf32>
    %83 = arith.maximumf %81, %82 : vector<16x256xf32>
    %c0_29 = arith.constant 0 : index
    %c0_30 = arith.constant 0 : index
    %84 = vector.load %arg4[%c0_29, %c0_30] : memref<8x16xf32, #tpu.memory_space<vmem>>, vector<8x16xf32>
    %cst_31 = arith.constant dense<0.000000e+00> : vector<8x256xf32>
    %85 = tpu.matmul %84, %83, %cst_31 {dimension_numbers = #tpu.dot_dimension_numbers<[1], [0], [0], [1], [0, 0, 1, 1], [], []>} : vector<8x16xf32>, vector<16x256xf32>, vector<8x256xf32> -> vector<8x256xf32>
    %c0_32 = arith.constant 0 : index
    %c0_33 = arith.constant 0 : index
    %86 = vector.load %arg5[%c0_32, %c0_33] : memref<8x1xf32, #tpu.memory_space<vmem>>, vector<8x1xf32>
    %87 = vector.broadcast %86 : vector<8x1xf32> to vector<8x256xf32>
    %88 = arith.addf %85, %87 : vector<8x256xf32>
    %cst_34 = arith.constant 0.000000e+00 : f32
    %89 = vector.broadcast %cst_34 : f32 to vector<8x256xf32>
    %90 = arith.subf %89, %88 : vector<8x256xf32>
    %91 = math.exp %90 : vector<8x256xf32>
    %cst_35 = arith.constant 1.000000e+00 : f32
    %92 = vector.broadcast %cst_35 : f32 to vector<8x256xf32>
    %93 = arith.addf %92, %91 : vector<8x256xf32>
    %94 = tpu.reciprocal %93 {approx = true} : vector<8x256xf32> -> vector<8x256xf32>
    %95 = arith.mulf %93, %94 : vector<8x256xf32>
    %cst_36 = arith.constant 2.000000e+00 : f32
    %96 = vector.broadcast %cst_36 : f32 to vector<8x256xf32>
    %97 = arith.subf %96, %95 : vector<8x256xf32>
    %98 = arith.mulf %94, %97 : vector<8x256xf32>
    %99 = arith.mulf %1, %98 : vector<8x256xf32>
    %c0_37 = arith.constant 0 : index
    %c0_38 = arith.constant 0 : index
    %c0_39 = arith.constant 0 : index
    %100 = vector.load %arg6[%c0_37, %c0_38, %c0_39] : memref<1x8x256xf32, #tpu.memory_space<vmem>>, vector<1x8x256xf32>
    %101 = vector.shape_cast %100 : vector<1x8x256xf32> to vector<8x256xf32>
    %102 = vector.shape_cast %99 : vector<8x256xf32> to vector<1x8x256xf32>
    tpu.vector_store %arg6[%c0_37, %c0_38, %c0_39], %102 {strides = array<i32>} : memref<1x8x256xf32, #tpu.memory_space<vmem>>, vector<1x8x256xf32>,
    return
  }
  func.func @transform_0(%arg0: i32) -> (i32, i32, i32) {
    %c0_i32 = arith.constant 0 : i32
    %c0_i32_0 = arith.constant 0 : i32
    %c0_i32_1 = arith.constant 0 : i32
    return %arg0, %c0_i32, %c0_i32_0 : i32, i32, i32
  }
  func.func @transform_1(%arg0: i32) -> (i32, i32) {
    %c0_i32 = arith.constant 0 : i32
    %c0_i32_0 = arith.constant 0 : i32
    %c0_i32_1 = arith.constant 0 : i32
    return %c0_i32, %c0_i32_0 : i32, i32
  }
  func.func @transform_2(%arg0: i32) -> (i32, i32) {
    %c0_i32 = arith.constant 0 : i32
    %c0_i32_0 = arith.constant 0 : i32
    %c0_i32_1 = arith.constant 0 : i32
    return %c0_i32, %c0_i32_0 : i32, i32
  }
  func.func @transform_3(%arg0: i32) -> (i32, i32) {
    %c0_i32 = arith.constant 0 : i32
    %c0_i32_0 = arith.constant 0 : i32
    %c0_i32_1 = arith.constant 0 : i32
    return %c0_i32, %c0_i32_0 : i32, i32
  }
  func.func @transform_4(%arg0: i32) -> (i32, i32) {
    %c0_i32 = arith.constant 0 : i32
    %c0_i32_0 = arith.constant 0 : i32
    %c0_i32_1 = arith.constant 0 : i32
    return %c0_i32, %c0_i32_0 : i32, i32
  }
  func.func @transform_5(%arg0: i32) -> (i32, i32, i32) {
    %c0_i32 = arith.constant 0 : i32
    %c0_i32_0 = arith.constant 0 : i32
    %c0_i32_1 = arith.constant 0 : i32
    return %arg0, %c0_i32, %c0_i32_0 : i32, i32, i32
  }
}

</mosaic_0001>

<bundles_post_ra>
// kernel: tpu_custom_call.1
= control target key start
LH: loop header
LB: loop body
LE: loop exit
PB: predicated region body
PF: predicated region fallthrough
CT: control target
= control target key end

     0   :  { %10 = vsyncpa [#allocation3], 0  ;;  %s1028_s0 = inlined_call_operand.vmem [shape: f32[2,8,256], index: 0, kind: input, shape index: {}]   ;;  %s1029_s1 = inlined_call_operand.vmem [shape: f32[16,8], index: 1, kind: input, shape index: {}]   ;;  %s1030_s2 = inlined_call_operand.vmem [shape: f32[16,1], index: 2, kind: input, shape index: {}]   ;;  %s1031_s3 = inlined_call_operand.vmem [shape: f32[8,16], index: 3, kind: input, shape index: {}]   ;;  %s1032_s4 = inlined_call_operand.vmem [shape: f32[8,1], index: 4, kind: input, shape index: {}]   ;;  %s1033_s5 = inlined_call_operand.hbm [shape: f32[2,8,256], index: 5, kind: output, shape index: {}]  }
   0x1   :  { %12 = vsyncpa [#allocation3 + $0x1], 0  ;;  %s851_s18 = smov 0   ;;  %s853_s19 = smov 0  }
   0x2   :  { %s855_s20 = smov 0   ;;  %s857_s21 = smov 0  }
   0x3 LB: > { %s872_s22 = sadd.s32 4294967295, %s804_s21   ;;  %s664_s23 = sadd.s32 4294967294, %s804_s21   ;;  %s804_s21 = sphi %s857_s21, %s1039_s21   ;;  %s800_s20 = sphi %s855_s20, %s1038_s20   ;;  %s796_s19 = sphi %s853_s19, %s1037_s19   ;;  %s792_s18 = sphi %s851_s18, %s1036_s18  }
   0x4   : > { %s876_s24 = sadd.s32 1, %s804_s21   ;;  %s135_s25 = sadd.s32 1, %s800_s20 }
   0x5   : > { %s132_s26 = ssub.s32 %s804_s21, %s876_s24  ;;  %p145_p0 = scmp.ne.s32.totalorder %s800_s20, %s796_s19 }
   0x6   : > { %p133_p1 = scmp.eq.s32.totalorder %s132_s26, 0  ;;  %p146_p2 = scmp.eq.s32.totalorder %s872_s22, 1 }
   0x7   : > { %p151_p3 = scmp.ne.s32.totalorder %s796_s19, %s792_s18  ;;  %p152_p4 = scmp.eq.s32.totalorder %s664_s23, 1 }
   0x8   : > { %s887_s27 = scalar_select %p133_p1, %s800_s20, %s135_s25  }
   0x9   : > { %p889_p5 = por %p146_p2, %p145_p0  ;;  %p893_p6 = por %p152_p4, %p151_p3 }
   0xa   : > { %p667_p7 = scmp.ge.s32.totalorder %s804_s21, 1  ;;  %p190_p8 = scmp.lt.s32.totalorder %s804_s21, 3 }
   0xc   : > { %p191_p9 = pnand %p667_p7, %p190_p8 }
   0xd   : > { %p218_p10 = scmp.lt.s32.totalorder (!%p191_p9), %s872_s22, 1  ;;  %s806_s10 = smov (!%p191_p9), 2  }
   0xe   : > { %194 = sbr.rel (%p191_p9) target bundleno = 763 (0x2fb), region = 40  ;;  %s807_s11 = smov (!%p191_p9), 3  }
   0xf   : > { %s808_s12 = smov (!%p191_p9), 1   ;;  %s809_s13 = smov (!%p191_p9), 127  }
  0x10   : > { %s810_s14 = smov (!%p191_p9), 126   ;;  %s811_s15 = smov (!%p191_p9), 125  }
  0x11   : > { %s812_s16 = smov (!%p191_p9), 48   ;;  %s813_s17 = smov (!%p191_p9), 32  }
  0x12   : > { %s814_s23 = smov (!%p191_p9), 16   ;;  %s815_s25 = smov (!%p191_p9), 112  }
  0x13   : > { %s219_s30 = scalar_select %p218_p10, %s872_s22, 1  ;;  %v225_v2 = vlaneseq  ;;  %v816_v55 = vmov 0.0   ;;  %v818_v56 = vmov 0   ;;  %v388_v57 = vld [vmem:[%s1030_s2] sm:$0xff]  ;;  %v389_v58 = vld [vmem:[%s1030_s2 + $0x8] sm:$0xff] }
  0x14   : > { %471 = vmatprep.mubr.f32.mxu0 %v816_v55  ;;  %563 = vmatprep.mubr.f32.mxu1 %v816_v55  ;;  %s817_s26 = smov 96   ;;  %v489_v59 = vld [vmem:[%s1032_s4] sm:$0xff] }
  0x15   : > { %s679_s6 = sshll.u32 %s219_s30, 4  ;;  %v920_v3 = vand.u32 127, %v225_v2  ;;  %735 = vset.pattern.permute.xlu1 %v818_v56  ;;  %734 = vset.pattern.permute.xlu0 %v818_v56  ;;  %s819_s30 = smov 80   ;;  %v488_v56 = vld [vmem:[%s1031_s3] sm:$0xff] }
  0x16   : > { %s222_s9 = scalar_lea.vmem %s1028_s0, %s679_s6 }
  0x17   : > { %v904_v0 = vld [vmem:[%s222_s9] sm:$0xff]  ;;  %v908_v1 = vld [vmem:[%s222_s9 + $0x8] sm:$0xff]  ;;  %v923_v4 = vadd.s32 128, %v920_v3  ;;  %v926_v5 = vand.u32 15, %v920_v3  ;;  %vm234_vm0 = vcmp.lt.s32.totalorder %v920_v3, 3  ;;  %vm247_vm3 = vcmp.lt.s32.totalorder %v920_v3, 2 }
  0x18   : > { %243 = vrot.lane.b32.xlu1 %v904_v0, %s806_s10  ;;  %230 = vrot.lane.b32.xlu0 %v904_v0, %s807_s11  ;;  %vm260_vm6 = vcmp.lt.s32.totalorder %v920_v3, 1  ;;  %vm273_vm7 = vcmp.lt.s32.totalorder %v920_v3, 127  ;;  %vm286_vm12 = vcmp.lt.s32.totalorder %v920_v3, 126  ;;  %vm299_vm15 = vcmp.lt.s32.totalorder %v920_v3, 125 }
  0x19   : > { %v929_v6 = vand.u32 15, %v923_v4  ;;  %vm237_vm1 = vcmp.ge.s32.totalorder %v926_v5, 3  ;;  %vm250_vm4 = vcmp.ge.s32.totalorder %v926_v5, 2  ;;  %vm263_vm8 = vcmp.ge.s32.totalorder %v926_v5, 1 }
  0x1a   : > { %vm276_vm10 = vcmp.lt.s32.totalorder %v926_v5, 15  ;;  %vm289_vm13 = vcmp.lt.s32.totalorder %v926_v5, 14 }
  0x1b   : > { %vm238_vm2 = vcmp.ge.s32.totalorder %v929_v6, 3  ;;  %vm251_vm5 = vcmp.ge.s32.totalorder %v929_v6, 2  ;;  %vm264_vm9 = vcmp.ge.s32.totalorder %v929_v6, 1  ;;  %vm277_vm11 = vcmp.lt.s32.totalorder %v929_v6, 15 }
  0x1c   : > { %245 = vrot.lane.b32.xlu1 %v908_v1, %s806_s10  ;;  %232 = vrot.lane.b32.xlu0 %v908_v1, %s807_s11  ;;  %vm290_vm14 = vcmp.lt.s32.totalorder %v929_v6, 14 }
  0x20   : > { %258 = vrot.lane.b32.xlu1 %v908_v1, %s808_s12  ;;  %256 = vrot.lane.b32.xlu0 %v904_v0, %s808_s12 }
  0x24   : > { %271 = vrot.lane.b32.xlu1 %v908_v1, %s809_s13  ;;  %269 = vrot.lane.b32.xlu0 %v904_v0, %s809_s13 }
  0x28   : > { %284 = vrot.lane.b32.xlu1 %v908_v1, %s810_s14  ;;  %282 = vrot.lane.b32.xlu0 %v904_v0, %s810_s14 }
  0x2c   : > { %297 = vrot.lane.b32.xlu1 %v908_v1, %s811_s15  ;;  %295 = vrot.lane.b32.xlu0 %v904_v0, %s811_s15 }
  0x8a   : > { %v244_v7 = vpop.permute.xlu1 %243  ;;  %v231_v8 = vpop.permute.xlu0 %230 }
  0x8e   : > { %v246_v9 = vpop.permute.xlu1 %245  ;;  %v233_v10 = vpop.permute.xlu0 %232 }
  0x8f   : > { %v235_v11 = vsel %vm234_vm0, %v231_v8, %v233_v10  ;;  %v236_v12 = vsel %vm234_vm0, %v233_v10, %v231_v8  ;;  %v248_v17 = vsel %vm247_vm3, %v244_v7, %v246_v9  ;;  %v249_v18 = vsel %vm247_vm3, %v246_v9, %v244_v7 }
  0x90   : > { %v239_v13 = vsel %vm237_vm1, %v236_v12, -inf  ;;  %v240_v14 = vsel %vm238_vm2, %v235_v11, -inf  ;;  %v252_v23 = vsel %vm250_vm4, %v249_v18, -inf  ;;  %v253_v24 = vsel %vm251_vm5, %v248_v17, -inf }
  0x91   : > { %v241_v19 = vmax.f32 %v904_v0, %v239_v13  ;;  %v242_v20 = vmax.f32 %v908_v1, %v240_v14  ;;  %vm302_vm0 = vcmp.lt.s32.totalorder %v926_v5, 13  ;;  %vm303_vm1 = vcmp.lt.s32.totalorder %v929_v6, 13 }
  0x92   : > { %v259_v15 = vpop.permute.xlu1 %258  ;;  %v257_v16 = vpop.permute.xlu0 %256  ;;  %vm312_vm2 = vcmp.lt.s32.totalorder %v920_v3, 48  ;;  %vm325_vm3 = vcmp.lt.s32.totalorder %v920_v3, 32  ;;  %vm315_vm4 = vcmp.ge.s32.totalorder %v920_v3, 48  ;;  %vm338_vm5 = vcmp.lt.s32.totalorder %v920_v3, 16 }
  0x93   : > { %v261_v21 = vsel %vm260_vm6, %v257_v16, %v259_v15  ;;  %v262_v22 = vsel %vm260_vm6, %v259_v15, %v257_v16  ;;  %v254_v27 = vmax.f32 %v241_v19, %v252_v23  ;;  %v255_v28 = vmax.f32 %v242_v20, %v253_v24 }
  0x94   : > { %v265_v31 = vsel %vm263_vm8, %v262_v22, -inf  ;;  %v266_v32 = vsel %vm264_vm9, %v261_v21, -inf  ;;  %vm328_vm6 = vcmp.ge.s32.totalorder %v920_v3, 32  ;;  %vm351_vm8 = vcmp.lt.s32.totalorder %v920_v3, 112 }
  0x95   : > { %v267_v37 = vmax.f32 %v254_v27, %v265_v31  ;;  %v268_v38 = vmax.f32 %v255_v28, %v266_v32  ;;  %vm355_vm9 = vcmp.lt.s32.totalorder %v923_v4, 240 }
  0x96   : > { %v272_v25 = vpop.permute.xlu1 %271  ;;  %v270_v26 = vpop.permute.xlu0 %269 }
  0x97   : > { %v274_v29 = vsel %vm273_vm7, %v270_v26, %v272_v25  ;;  %v275_v30 = vsel %vm273_vm7, %v272_v25, %v270_v26  ;;  %vm341_vm7 = vcmp.ge.s32.totalorder %v920_v3, 16 }
  0x98   : > { %v278_v33 = vsel %vm276_vm10, %v274_v29, -inf  ;;  %v279_v34 = vsel %vm277_vm11, %v275_v30, -inf  ;;  %vm364_vm10 = vcmp.lt.s32.totalorder %v920_v3, 96  ;;  %vm368_vm11 = vcmp.lt.s32.totalorder %v923_v4, 224 }
  0x99   : > { %v280_v43 = vmax.f32 %v267_v37, %v278_v33  ;;  %v281_v44 = vmax.f32 %v268_v38, %v279_v34 }
  0x9a   : > { %v285_v35 = vpop.permute.xlu1 %284  ;;  %v283_v36 = vpop.permute.xlu0 %282 }
  0x9b   : > { %v287_v39 = vsel %vm286_vm12, %v283_v36, %v285_v35  ;;  %v288_v40 = vsel %vm286_vm12, %v285_v35, %v283_v36  ;;  %vm377_vm12 = vcmp.lt.s32.totalorder %v920_v3, 80  ;;  %v387_v3 = vld [vmem:[%s1029_s1 + $0x8] sm:$0xff] }
  0x9c   : > { %v291_v41 = vsel %vm289_vm13, %v287_v39, -inf  ;;  %v292_v42 = vsel %vm290_vm14, %v288_v40, -inf  ;;  %vm381_vm13 = vcmp.lt.s32.totalorder %v923_v4, 208  ;;  %vm400_vm14 = vcmask 64512  }
  0x9d   : > { %v293_v47 = vmax.f32 %v280_v43, %v291_v41  ;;  %v294_v48 = vmax.f32 %v281_v44, %v292_v42  ;;  %v386_v42 = vld [vmem:[%s1029_s1] sm:$0xff] }
  0x9e   : > { %v298_v45 = vpop.permute.xlu1 %297  ;;  %v296_v46 = vpop.permute.xlu0 %295 }
  0x9f   : > { %v300_v49 = vsel %vm299_vm15, %v296_v46, %v298_v45  ;;  %v301_v50 = vsel %vm299_vm15, %v298_v45, %v296_v46  ;;  %vm495_vm15 = vcmask 130048  }
  0xa0   : > { %v304_v51 = vsel %vm302_vm0, %v300_v49, -inf  ;;  %v305_v52 = vsel %vm303_vm1, %v301_v50, -inf }
  0xa1   : > { %v306_v53 = vmax.f32 %v293_v47, %v304_v51  ;;  %v307_v54 = vmax.f32 %v294_v48, %v305_v52 }
  0xa3   : > { %310 = vrot.lane.b32.xlu1 %v307_v54, %s812_s16  ;;  %308 = vrot.lane.b32.xlu0 %v306_v53, %s812_s16 }
  0xa7   : > { %323 = vrot.lane.b32.xlu1 %v307_v54, %s813_s17  ;;  %321 = vrot.lane.b32.xlu0 %v306_v53, %s813_s17 }
  0xab   : > { %336 = vrot.lane.b32.xlu1 %v307_v54, %s814_s23  ;;  %334 = vrot.lane.b32.xlu0 %v306_v53, %s814_s23  ;;  %s215_s23 = sand.u32 1, %s796_s19  }
  0xac   : > { %s591_s10 = scalar_lea.sflag [#allocation3], %s215_s23 }
  0xaf   : > { %349 = vrot.lane.b32.xlu1 %v307_v54, %s815_s25  ;;  %347 = vrot.lane.b32.xlu0 %v306_v53, %s815_s25  ;;  %s668_s25 = sshll.u32 %s215_s23, 4 }
  0xb3   : > { %362 = vrot.lane.b32.xlu1 %v307_v54, %s817_s26  ;;  %360 = vrot.lane.b32.xlu0 %v306_v53, %s817_s26  ;;  %s680_s26 = sshll.u32 %s872_s22, 8  ;;  %s820_s22 = smov [#allocation2]  }
  0xb4   : > { %s603_s9 = scalar_lea.hbm %s1033_s5, %s680_s26  ;;  %s748_s12 = sshll.u32 %s820_s22, 4  ;;  %s749_s12 = int_to_ptr.vmem [resolvable:$false] %s748_s12 }
  0xb5   : > { %s750_s13 = scalar_lea.vmem %s749_s12, 512 }
  0xb7   : > { %375 = vrot.lane.b32.xlu1 %v307_v54, %s819_s30  ;;  %373 = vrot.lane.b32.xlu0 %v306_v53, %s819_s30  ;;  %s217_s30 = scalar_lea.vmem [#allocation2], %s668_s25 }
  0xb8   : > { %s605_s6 = sshll.u32 %s217_s30, 4  ;;  %s606_s6 = int_to_ptr.vmem [resolvable:$true] %s605_s6 }
  0xb9   : > { %s744_s11 = scalar_lea.vmem %s606_s6, 256  ;;  %p751_p0 = scmp.lt.s32.totalorder %s606_s6, %s749_s12 }
  0xba   : > { %p745_p11 = scmp.ne.s32.totalorder %s606_s6, %s744_s11  ;;  %p752_p1 = scmp.lt.s32.totalorder %s750_s13, %s744_s11 }
  0xbb   : > { %392 = vperm.xlu1 %735, %v388_v57   ;;  %397 = vperm.xlu0 %734, %v389_v58  }
  0xbc   : > { %p746_p12 = pnand %p745_p11, %p889_p5  ;;  %p753_p2 = por %p752_p1, %p751_p0 }
  0xbe   : > { %p747_p13 = pneg %p746_p12 }
  0xbf   : > { %492 = vperm.xlu1 %735, %v489_v59  }
  0xc0   : > { %p754_p3 = pnand %p753_p2, %p747_p13 }
 0x115   : > { %v311_v60 = vpop.permute.xlu1 %310  ;;  %v309_v61 = vpop.permute.xlu0 %308 }
 0x116   : > { %v314_v2 = vsel %vm312_vm2, %v311_v60, %v309_v61  ;;  %v313_v9 = vsel %vm312_vm2, %v309_v61, %v311_v60 }
 0x117   : > { %v317_v8 = vsel %vm315_vm4, %v314_v2, -inf  ;;  %v320_v16 = vmax.f32 %v307_v54, %v313_v9 }
 0x118   : > { %v319_v12 = vmax.f32 %v306_v53, %v317_v8 }
 0x119   : > { %v324_v62 = vpop.permute.xlu1 %323  ;;  %v322_v63 = vpop.permute.xlu0 %321 }
 0x11a   : > { %v327_v5 = vsel %vm325_vm3, %v324_v62, %v322_v63  ;;  %v326_v13 = vsel %vm325_vm3, %v322_v63, %v324_v62 }
 0x11b   : > { %v330_v11 = vsel %vm328_vm6, %v327_v5, -inf  ;;  %v333_v21 = vmax.f32 %v320_v16, %v326_v13 }
 0x11c   : > { %v332_v19 = vmax.f32 %v319_v12, %v330_v11 }
 0x11d   : > { %v337_v6 = vpop.permute.xlu1 %336  ;;  %v335_v7 = vpop.permute.xlu0 %334 }
 0x11e   : > { %v340_v10 = vsel %vm338_vm5, %v337_v6, %v335_v7  ;;  %v339_v20 = vsel %vm338_vm5, %v335_v7, %v337_v6 }
 0x11f   : > { %v343_v17 = vsel %vm341_vm7, %v340_v10, -inf  ;;  %v346_v26 = vmax.f32 %v333_v21, %v339_v20 }
 0x120   : > { %v345_v22 = vmax.f32 %v332_v19, %v343_v17 }
 0x121   : > { %v350_v14 = vpop.permute.xlu1 %349  ;;  %v348_v15 = vpop.permute.xlu0 %347 }
 0x122   : > { %v353_v18 = vsel %vm351_vm8, %v350_v14, %v348_v15  ;;  %v352_v27 = vsel %vm351_vm8, %v348_v15, %v350_v14 }
 0x123   : > { %v357_v23 = vsel %vm355_vm9, %v353_v18, -inf  ;;  %v358_v32 = vmax.f32 %v345_v22, %v352_v27 }
 0x124   : > { %v359_v30 = vmax.f32 %v346_v26, %v357_v23 }
 0x125   : > { %v363_v24 = vpop.permute.xlu1 %362  ;;  %v361_v25 = vpop.permute.xlu0 %360 }
 0x126   : > { %v366_v28 = vsel %vm364_vm10, %v363_v24, %v361_v25  ;;  %v365_v31 = vsel %vm364_vm10, %v361_v25, %v363_v24 }
 0x127   : > { %v370_v29 = vsel %vm368_vm11, %v366_v28, -inf  ;;  %v371_v38 = vmax.f32 %v358_v32, %v365_v31 }
 0x128   : > { %v372_v37 = vmax.f32 %v359_v30, %v370_v29 }
 0x129   : > { %v376_v33 = vpop.permute.xlu1 %375  ;;  %v374_v34 = vpop.permute.xlu0 %373 }
 0x12a   : > { %v378_v35 = vsel %vm377_vm12, %v374_v34, %v376_v33  ;;  %v379_v36 = vsel %vm377_vm12, %v376_v33, %v374_v34 }
 0x12b   : > { %v383_v39 = vsel %vm381_vm13, %v379_v36, -inf  ;;  %v384_v41 = vmax.f32 %v371_v38, %v378_v35 }
 0x12c   : > { %v385_v40 = vmax.f32 %v372_v37, %v383_v39 }
 0x12e   : > { %437 = vmatprep.subr.mxu0 %v385_v40 }
 0x12f   : > { %438 = vmatpush1.msra.mxu0 %v384_v41 }
 0x130   : > { %671 = vmatmul.mubr.msk.f32.vlgmr.msra.gmra.mxu0 %vm400_vm14, %v386_v42 }
 0x131   : > { %477 = vmatprep.mubr.f32.mxu0 %v816_v55 }
 0x134   : > { %672 = vmatmul.mubr.msk.f32.gmra.mxu0 %vm400_vm14, %v387_v3 }
 0x136   : > { %v398_v44 = vpop.permute.xlu0 %397  ;;  %v393_v46 = vpop.permute.xlu1 %392 }
 0x13a   : > { %v493_v57 = vpop.permute.xlu1 %492 }
 0x1f0   : > { %v473_v4 = vpop.f32.mrf.mxu0 }
 0x1f1   : > { %v474_v51 = vadd.f32 %v473_v4, %v393_v46 }
 0x1f2   : > { %v475_v43 = vpop.f32.mrf.mxu0 }
 0x1f3   : > { %v476_v49 = vadd.f32 %v475_v43, %v393_v46  ;;  %v484_v55 = vmax.f32 %v474_v51, 0.0 }
 0x1f4   : > { %v479_v45 = vpop.f32.mrf.mxu0 }
 0x1f5   : > { %v480_v47 = vadd.f32 %v479_v45, %v398_v44  ;;  %v485_v54 = vmax.f32 %v476_v49, 0.0 }
 0x1f6   : > { %v481_v48 = vpop.f32.mrf.mxu0 }
 0x1f7   : > { %v482_v50 = vadd.f32 %v481_v48, %v398_v44  ;;  %v486_v53 = vmax.f32 %v480_v47, 0.0 }
 0x1f9   : > { %v487_v52 = vmax.f32 %v482_v50, 0.0 }
 0x1fb   : > { %527 = vmatprep.subr.mxu1 %v487_v52 }
 0x1fc   : > { %528 = vmatpush1.msra.mxu1 %v486_v53 }
 0x1fd   : > { %529 = vmatprep.subr.mxu1 %v485_v54 }
 0x1fe   : > { %530 = vmatpush1.msra.mxu1 %v484_v55 }
 0x1ff   : > { %673 = vmatmul.mubr.msk.f32.vlgmr.msra.gmra.mxu1 %vm495_vm15, %v488_v56 }
 0x2bf   : > { %v565_v58 = vpop.f32.mrf.mxu1 }
 0x2c0   : > { %v566_v59 = vadd.f32 %v565_v58, %v493_v57 }
 0x2c1   : > { %v567_v60 = vpop.f32.mrf.mxu1 }
 0x2c2   : > { %v570_v61 = vsub.f32 0.0, %v566_v59  ;;  %v568_v62 = vadd.f32 %v567_v60, %v493_v57 }
 0x2c4   : > { %v572_v63 = vmul.f32 1.442695, %v570_v61  ;;  %v571_v2 = vsub.f32 0.0, %v568_v62 }
 0x2c6   : > { %736 = vpow2.f32 %v572_v63  ;;  %v574_v5 = vmul.f32 1.442695, %v571_v2 }
 0x2c8   : > { %738 = vpow2.f32 %v574_v5 }
 0x2d3   : > { %v737_v6 = vpop.eup %736 }
 0x2d4   : > { %v576_v7 = vadd.f32 1.0, %v737_v6 }
 0x2d5   : > { %v739_v8 = vpop.eup %738 }
 0x2d6   : > { %740 = vrcp.f32 %v576_v7  ;;  %v577_v9 = vadd.f32 1.0, %v739_v8 }
 0x2d8   : > { %742 = vrcp.f32 %v577_v9 }
 0x2e3   : > { %v741_v10 = vpop.eup %740 }
 0x2e4   : > { %v580_v11 = vmul.f32 %v741_v10, %v576_v7 }
 0x2e5   : > { %v743_v12 = vpop.eup %742 }
 0x2e6   : > { %v582_v13 = vsub.f32 2.0, %v580_v11  ;;  %v581_v14 = vmul.f32 %v743_v12, %v577_v9 }
 0x2e8   : > { %v583_v15 = vsub.f32 2.0, %v581_v14  ;;  %v584_v16 = vmul.f32 %v741_v10, %v582_v13 }
 0x2ea   : > { %v585_v17 = vmul.f32 %v743_v12, %v583_v15  ;;  %v586_v18 = vmul.f32 %v584_v16, %v904_v0 }
 0x2ec   : > { %v587_v19 = vmul.f32 %v585_v17, %v908_v1  ;;  %588 = vst [vmem:[%s217_s30] sm:$0xff] %v586_v18 }
 0x2ee   : > { %589 = vst [vmem:[%s217_s30 + $0x8] sm:$0xff] %v587_v19 }
 0x2ef   : > { %757 = shalt.err (!%p754_p3)
}
 0x2f0   : > { %s758_s14 = scalar_lea.hbm %s603_s9, 256  ;;  %s762_s17 = scalar_lea.hbm %s1033_s5, 512 }
 0x2f1   : > { %p759_p4 = scmp.ne.s32.totalorder %s603_s9, %s758_s14  ;;  %p763_p9 = scmp.lt.s32.totalorder %s603_s9, %s1033_s5 }
 0x2f2   : > { %p764_p10 = scmp.lt.s32.totalorder %s762_s17, %s758_s14 }
 0x2f3   : > { %p760_p7 = pnand %p759_p4, %p889_p5 }
 0x2f4   : > { %p765_p11 = por %p764_p10, %p763_p9 }
 0x2f5   : > { %p761_p8 = pneg %p760_p7 }
 0x2f7   : > { %p766_p12 = pnand %p765_p11, %p761_p8 }
 0x2f9   : > { %769 = shalt.err (!%p766_p12)
}
 0x2fa   : > { %681 = dma.vmem_to_hbm [thread:$0]  (%p889_p5), %s606_s6, 256, %s603_s9, %s591_s10  }
 0x2fb PF: > { %p687_p13 = scmp.ge.s32.totalorder %s804_s21, 2  ;;  %s617_s26 = sand.u32 1, %s792_s18  }
 0x2fc   : > { %s618_s30 = scalar_lea.sflag [#allocation3], %s617_s26 }
 0x2fd   : > { %p684_p0 = pnand %p687_p13, %p893_p6 }
 0x2ff   : > { %p685_p1 = pneg %p684_p0 }
 0x301   : > { %787 = dma.done.wait (%p685_p1), %s618_s30, 256  }
 0x302   : > { %789 = vsyncadd (%p685_p1), %s618_s30, 4294967040  ;;  %p15_p2 = scmp.ge.s32.totalorder %s876_s24, 4   ;;  %s1036_s18 = smov %s796_s19 }
 0x303   : > { %s1037_s19 = smov %s800_s20  ;;  %s1038_s20 = smov %s887_s27 }
 0x304   : > { %s1039_s21 = smov %s876_s24  ;;  %17 = sbr.rel (!%p15_p2) target bundleno = 3 (0x3), region = 75 }
 0x309   :  { %623 = vsyncpa [#allocation3], 1 }
 0x30a   :  { %625 = vsyncpa [#allocation3 + $0x1], 1 }

</bundles_post_ra>
